<compile_context>
chip_gen: v6e
topology: v6e:2x2x1
jax: 0.10.0
libtpu: 0.0.40
codegen_flags: <defaults>
</compile_context>

<pallas_src>
import functools
import math

import numpy as np

import jax
import jax.numpy as jnp
from jax.experimental import pallas as pl
from jax.experimental.pallas import tpu as pltpu


_BIG = float(np.finfo(np.float32).max)   # "+inf" stand-in for the positive min


def _lp_inter_kernel(feats_ref, feats_s_ref, labels_ref, labels_s_ref, out_ref,
                     a_ref, pos_ref, neg_ref, *,
                     inv_temp, num_instances, lane_width):
    j = pl.program_id(1)

    @pl.when(j == 0)
    def _init():
        # The feats block is constant along j: scale it by 1/temp once per row
        # block into a bf16 scratch and reuse it for every column tile.
        a_ref[...] = (feats_ref[...].astype(jnp.float32) * inv_temp
                      ).astype(jnp.bfloat16)
        pos_ref[...] = jnp.full_like(pos_ref, _BIG)
        neg_ref[...] = jnp.zeros_like(neg_ref)

    # (tm, tk) = (tm, C) . (tk, C)^T on the MXU, bf16 in / f32 accumulate.
    # Trans-B dimension_numbers are MXU-native (flash-attention pattern); a
    # wrapper-side pre-transpose of feats_s is only needed if a bundle dump ever
    # shows a per-tile vxpose here.
    sim = jax.lax.dot_general(
        a_ref[...], feats_s_ref[...],
        dimension_numbers=(((1,), (1,)), ((), ())),
        preferred_element_type=jnp.float32)                  # (tm, tk) f32
    # NOTE: like the torch code, no max-subtraction stabilisation; exp can
    # overflow for unnormalised features / very small temperatures.
    e = jnp.exp(sim)

    pos_mask = labels_s_ref[...] == labels_ref[...]          # (1,tk)==(tm,1)->(tm,tk)

    tk = e.shape[-1]
    g = num_instances
    lw = lane_width
    n_chunks = tk // lw

    # ---- hardest positive: running elementwise min into a lane-dense (tm, lw)
    # accumulator (pure VPU per grid step; the cross-lane reduce happens once in
    # the finalize instead of every step).
    pos_part = pos_ref[...]
    for c in range(n_chunks):
        sl = slice(c * lw, (c + 1) * lw)
        pos_part = jnp.minimum(pos_part, jnp.where(pos_mask[:, sl], e[:, sl], _BIG))
    pos_ref[...] = pos_part

    # ---- hardest negative per support-identity block.
    # exp(sim) > 0, so masking positives to 0 makes all-positive blocks
    # contribute 0 (exactly like the torch reshape-over-negatives path).
    col = jax.lax.broadcasted_iota(jnp.int32, (1, tk), 1)
    phase = col % g                                          # within-block lane phase
    y = jnp.where(pos_mask, 0.0, e)                          # (tm, tk) f32, >= 0
    # Block-wise max via log2(g) single-direction roll-doubling steps with a
    # static same-block mask.  pltpu.roll follows jnp.roll semantics
    # (out[c] = in[(c - s) % tk]), so s = tk - step pulls the value `step` lanes
    # to the right onto lane c; accept it only if that source lane belongs to
    # the same identity block, i.e. phase(c) < g - step (compile-time mask).
    step = 1
    while step < g:
        y_r = pltpu.roll(y, tk - step, axis=1)
        y = jnp.where(phase < (g - step), jnp.maximum(y, y_r), y)
        step *= 2
    # Lane 0 of every block now holds that block's max; fuse the block-leading
    # lane selection into the lane-dense partial sum (no extra (tm, tk) temps).
    lead = phase == 0
    neg_part = neg_ref[...]
    for c in range(n_chunks):
        sl = slice(c * lw, (c + 1) * lw)
        neg_part = neg_part + jnp.where(lead[:, sl], y[:, sl], 0.0)
    neg_ref[...] = neg_part

    @pl.when(j == pl.num_programs(1) - 1)
    def _finalize():
        pos = jnp.min(pos_ref[...], axis=-1, keepdims=True)   # (tm, 1)
        neg = jnp.sum(neg_ref[...], axis=-1, keepdims=True)   # (tm, 1)
        denom = pos + neg + 1e-6
        # Exact division: finalize touches only tm elements once per row block,
        # so the approximate EUP reciprocal would save nothing.
        out_ref[...] = -jnp.log(pos / denom + 1e-6)


def _lcm(a, b):
    return a * b // math.gcd(a, b)


def _pick_tile(total, multiple, cap):
    """Largest tile <= cap that is a multiple of `multiple` and divides `total`.
    Falls back to the full extent (always a legal block shape) otherwise."""
    if total % multiple != 0:
        return total
    t = (min(cap, total) // multiple) * multiple
    while t >= multiple:
        if total % t == 0:
            return t
        t -= multiple
    return total


def _vmem_limit_bytes(tm, tk, C):
    """Scoped-VMEM budget derived from the actual tile footprint."""
    est = (2 * tk * C * 2            # feats_s double buffer (bf16)
           + 2 * tm * C * 2          # feats double buffer (bf16)
           + tm * C * 2              # 1/temp-scaled feats scratch (bf16)
           + 2 * tm * 128 * 4        # lane-dense accumulators (f32)
           + 2 * (tm + tk) * 4       # label buffers
           + 2 * tm * 4              # output buffer
           + 6 * tm * tk * 4)        # live (tm, tk) f32 temporaries (e, mask, y, ...)
    est = int(est * 1.25) + (2 << 20)   # headroom for compiler-internal scratch
    cap = 56 * 1024 * 1024               # safe on every generation (v7x: 64 MiB / TC)
    try:
        cap = max(cap, int(pltpu.get_tpu_info().vmem_capacity_bytes) * 7 // 8)
    except Exception:
        pass
    return max(32 * 1024 * 1024, min(est, cap))


def criterion_lp_inter(feats, feats_s, labels, labels_s, *,
                       temp_lp_loss, num_instances,
                       row_block_cap=256, col_block_cap=1024):
    """feats (B, C), feats_s (B_s, ...), labels (B,), labels_s (B_s,) -> scalar.

    col_block_cap of 512-1024 is safe on every generation (v7x has 64 MiB
    VMEM/TC); on v6e (128 MiB) 2048-4096 amortises per-step overhead better —
    the VMEM limit is derived from the tile footprint so the knobs stay coupled.
    """
    feats = jnp.asarray(feats)
    feats_s = jnp.asarray(feats_s)
    B, C = feats.shape
    feats_s = feats_s.reshape(feats_s.shape[0], -1)
    B_s, C_s = feats_s.shape
    assert C_s == C, "feature dims of feats and feats_s must match"
    num_instances = int(num_instances)
    assert B_s % num_instances == 0, "support set must be block-structured"
    # TODO(synk): the torch try/except fallback ("use all negative samples" when a
    # row's negative count is not divisible by num_instances) is not implemented;
    # only the block-structured (normal) path is.

    # Keep grid[0] >= 2 where possible so the "parallel" row axis can feed both
    # TensorCores on v7x (harmless extra row program on single-TC v5e/v6e).
    tm = _pick_tile(B, 8, min(row_block_cap, max(8, B // 2)))
    tk = _pick_tile(B_s, _lcm(128, num_instances), col_block_cap)
    lane_width = 128 if tk % 128 == 0 else tk
    grid = (B // tm, B_s // tk)

    labels2 = jnp.asarray(labels).astype(jnp.int32).reshape(B, 1)
    labels_s2 = jnp.asarray(labels_s).astype(jnp.int32).reshape(1, B_s)
    fa = feats.astype(jnp.bfloat16)          # bf16 MXU inputs, f32 accumulation
    fb = feats_s.astype(jnp.bfloat16)

    kernel = functools.partial(
        _lp_inter_kernel,
        inv_temp=1.0 / float(temp_lp_loss),
        num_instances=num_instances,
        lane_width=lane_width,
    )

    per_row = pl.pallas_call(
        kernel,
        out_shape=jax.ShapeDtypeStruct((B, 1), jnp.float32),
        grid_spec=pltpu.PrefetchScalarGridSpec(
            num_scalar_prefetch=0,
            grid=grid,
            in_specs=[
                pl.BlockSpec((tm, C), lambda i, j: (i, 0)),    # feats row block
                # feats_s is the only real HBM stream; keep default depth-2
                # buffering (bump to pl.Buffered(3) only if xprof shows exposed DMA).
                pl.BlockSpec((tk, C), lambda i, j: (j, 0)),    # support column block
                pl.BlockSpec((tm, 1), lambda i, j: (i, 0)),    # labels
                pl.BlockSpec((1, tk), lambda i, j: (0, j)),    # labels_s
            ],
            out_specs=pl.BlockSpec((tm, 1), lambda i, j: (i, 0)),
            scratch_shapes=[
                pltpu.VMEM((tm, C), jnp.bfloat16),           # 1/temp-scaled feats cache
                pltpu.VMEM((tm, lane_width), jnp.float32),   # lane-dense running pos min
                pltpu.VMEM((tm, lane_width), jnp.float32),   # lane-dense running neg sum
            ],
        ),
        compiler_params=pltpu.CompilerParams(
            dimension_semantics=("parallel", "arbitrary"),
            vmem_limit_bytes=_vmem_limit_bytes(tm, tk, C),
        ),
        cost_estimate=pl.CostEstimate(
            flops=2 * B * B_s * C,
            transcendentals=B * B_s,
            # feats_s (bf16) is re-streamed once per row block (B // tm passes).
            bytes_accessed=int(2 * B * C + (B // tm) * 2 * B_s * C
                               + 4 * (B + B_s) + 4 * B),
        ),
    )(fa, fb, labels2, labels_s2)

    return jnp.mean(per_row)


def _reference_loss(feats, feats_s, labels, labels_s, temp, num_instances):
    """NumPy mirror of the torch forward (with the kernel's bf16 input rounding)."""
    inv_temp = 1.0 / float(temp)
    fa_bf = (jnp.asarray(feats).astype(jnp.bfloat16).astype(jnp.float32)
             * inv_temp).astype(jnp.bfloat16)
    fa = np.asarray(fa_bf.astype(jnp.float32), dtype=np.float64)
    fb = np.asarray(jnp.asarray(feats_s).astype(jnp.bfloat16).astype(jnp.float32),
                    dtype=np.float64)
    labels = np.asarray(labels)
    labels_s = np.asarray(labels_s)
    e = np.exp(fa @ fb.T)                                    # (B, B_s)
    B = fa.shape[0]
    total = 0.0
    for i in range(B):
        is_pos = labels_s == labels[i]
        pos = np.min(e[i][is_pos])
        sim_negs = e[i][~is_pos].reshape(-1, num_instances)
        neg = np.max(sim_negs, axis=1).sum()
        total += -np.log(pos / (pos + neg + 1e-6) + 1e-6)
    return total / B


if __name__ == "__main__":
    key = jax.random.PRNGKey(0)
    B, C = 16, 64
    num_ids, num_instances = 64, 4
    B_s = num_ids * num_instances                            # 256 support columns
    temp_lp_loss = 0.1

    k1, k2 = jax.random.split(key)
    feats = jax.random.normal(k1, (B, C), jnp.float32)
    feats_s = jax.random.normal(k2, (B_s, C), jnp.float32)
    # L2-normalise features (typical for embedding similarities; keeps exp in range).
    feats = feats / jnp.linalg.norm(feats, axis=-1, keepdims=True)
    feats_s = feats_s / jnp.linalg.norm(feats_s, axis=-1, keepdims=True)

    labels = jnp.arange(B, dtype=jnp.int32) % num_ids
    labels_s = jnp.repeat(jnp.arange(num_ids, dtype=jnp.int32), num_instances)

    # Small tile caps so the demo exercises a real (2, 2) grid: the running
    # lane-dense accumulators, init/finalize pl.when paths, the streamed column
    # reduction and a >=2-program parallel row axis.
    loss = criterion_lp_inter(feats, feats_s, labels, labels_s,
                              temp_lp_loss=temp_lp_loss,
                              num_instances=num_instances,
                              row_block_cap=8, col_block_cap=128)
    loss = jax.block_until_ready(loss)

    ref = _reference_loss(feats, feats_s, labels, labels_s,
                          temp_lp_loss, num_instances)
    err = abs(float(loss) - float(ref))
    assert err <= 5e-3 * max(1.0, abs(float(ref))), (float(loss), float(ref), err)
    print("KERNEL_OK")
</pallas_src>

<mosaic_0001>
module attributes {stable_mosaic.version = 11 : i64} {
  func.func @_lp_inter_kernel(%arg0: i32, %arg1: i32, %arg2: memref<8x64xbf16, #tpu.memory_space<vmem>>, %arg3: memref<128x64xbf16, #tpu.memory_space<vmem>>, %arg4: memref<8x1xi32, #tpu.memory_space<vmem>>, %arg5: memref<1x128xi32, #tpu.memory_space<vmem>>, %arg6: memref<8x1xf32, #tpu.memory_space<vmem>>, %arg7: memref<8x64xbf16, #tpu.memory_space<vmem>>, %arg8: memref<8x128xf32, #tpu.memory_space<vmem>>, %arg9: memref<8x128xf32, #tpu.memory_space<vmem>>) attributes {dimension_semantics = [#tpu.dimension_semantics<parallel>, #tpu.dimension_semantics<arbitrary>], iteration_bounds = array<i64: 2, 2>, scalar_prefetch = 0 : i64, scratch_operands = 3 : i64, tpu.core_type = #tpu.core_type<tc>, window_params = [{transform_indices = @transform_0, window_bounds = array<i64: 8, 64>}, {transform_indices = @transform_1, window_bounds = array<i64: 128, 64>}, {transform_indices = @transform_2, window_bounds = array<i64: 8, 1>}, {transform_indices = @transform_3, window_bounds = array<i64: 1, 128>}, {transform_indices = @transform_4, window_bounds = array<i64: 8, 1>}]} {
    %c0_i32 = arith.constant 0 : i32
    %0 = arith.cmpi eq, %arg1, %c0_i32 : i32
    %1 = arith.extui %0 : i1 to i32
    %c0_i32_0 = arith.constant 0 : i32
    %2 = arith.cmpi ne, %1, %c0_i32_0 : i32
    scf.if %2 {
      %c0_26 = arith.constant 0 : index
      %c0_27 = arith.constant 0 : index
      %62 = vector.load %arg2[%c0_26, %c0_27] : memref<8x64xbf16, #tpu.memory_space<vmem>>, vector<8x64xbf16>
      %63 = arith.extf %62 : vector<8x64xbf16> to vector<8x64xf32>
      %cst_28 = arith.constant 1.000000e+01 : f32
      %64 = vector.broadcast %cst_28 : f32 to vector<8x64xf32>
      %65 = arith.mulf %63, %64 : vector<8x64xf32>
      %66 = arith.truncf %65 : vector<8x64xf32> to vector<8x64xbf16>
      %c0_29 = arith.constant 0 : index
      %c0_30 = arith.constant 0 : index
      %67 = vector.load %arg7[%c0_29, %c0_30] : memref<8x64xbf16, #tpu.memory_space<vmem>>, vector<8x64xbf16>
      tpu.vector_store %arg7[%c0_29, %c0_30], %66 {strides = array<i32>} : memref<8x64xbf16, #tpu.memory_space<vmem>>, vector<8x64xbf16>,
      %cst_31 = arith.constant 3.40282347E+38 : f32
      %68 = vector.broadcast %cst_31 : f32 to vector<8x128xf32>
      %c0_32 = arith.constant 0 : index
      %c0_33 = arith.constant 0 : index
      %69 = vector.load %arg8[%c0_32, %c0_33] : memref<8x128xf32, #tpu.memory_space<vmem>>, vector<8x128xf32>
      tpu.vector_store %arg8[%c0_32, %c0_33], %68 {strides = array<i32>} : memref<8x128xf32, #tpu.memory_space<vmem>>, vector<8x128xf32>,
      %cst_34 = arith.constant 0.000000e+00 : f32
      %70 = vector.broadcast %cst_34 : f32 to vector<8x128xf32>
      %c0_35 = arith.constant 0 : index
      %c0_36 = arith.constant 0 : index
      %71 = vector.load %arg9[%c0_35, %c0_36] : memref<8x128xf32, #tpu.memory_space<vmem>>, vector<8x128xf32>
      tpu.vector_store %arg9[%c0_35, %c0_36], %70 {strides = array<i32>} : memref<8x128xf32, #tpu.memory_space<vmem>>, vector<8x128xf32>,
    } else {
    }
    %c0 = arith.constant 0 : index
    %c0_1 = arith.constant 0 : index
    %3 = vector.load %arg7[%c0, %c0_1] : memref<8x64xbf16, #tpu.memory_space<vmem>>, vector<8x64xbf16>
    %c0_2 = arith.constant 0 : index
    %c0_3 = arith.constant 0 : index
    %4 = vector.load %arg3[%c0_2, %c0_3] : memref<128x64xbf16, #tpu.memory_space<vmem>>, vector<128x64xbf16>
    %cst = arith.constant dense<0.000000e+00> : vector<8x128xf32>
    %5 = tpu.matmul %3, %4, %cst {dimension_numbers = #tpu.dot_dimension_numbers<[1], [1], [0], [0], [0, 0, 1, 0], [], []>} : vector<8x64xbf16>, vector<128x64xbf16>, vector<8x128xf32> -> vector<8x128xf32>
    %6 = math.exp %5 : vector<8x128xf32>
    %c0_4 = arith.constant 0 : index
    %c0_5 = arith.constant 0 : index
    %7 = vector.load %arg5[%c0_4, %c0_5] : memref<1x128xi32, #tpu.memory_space<vmem>>, vector<1x128xi32>
    %c0_6 = arith.constant 0 : index
    %c0_7 = arith.constant 0 : index
    %8 = vector.load %arg4[%c0_6, %c0_7] : memref<8x1xi32, #tpu.memory_space<vmem>>, vector<8x1xi32>
    %9 = vector.broadcast %7 : vector<1x128xi32> to vector<8x128xi32>
    %10 = vector.broadcast %8 : vector<8x1xi32> to vector<8x128xi32>
    %11 = arith.cmpi eq, %9, %10 : vector<8x128xi32>
    %c0_8 = arith.constant 0 : index
    %c0_9 = arith.constant 0 : index
    %12 = vector.load %arg8[%c0_8, %c0_9] : memref<8x128xf32, #tpu.memory_space<vmem>>, vector<8x128xf32>
    %cst_10 = arith.constant 3.40282347E+38 : f32
    %13 = vector.broadcast %cst_10 : f32 to vector<8x128xf32>
    %14 = arith.select %11, %6, %13 : vector<8x128xi1>, vector<8x128xf32>
    %15 = arith.minimumf %12, %14 : vector<8x128xf32>
    %c0_11 = arith.constant 0 : index
    %c0_12 = arith.constant 0 : index
    %16 = vector.load %arg8[%c0_11, %c0_12] : memref<8x128xf32, #tpu.memory_space<vmem>>, vector<8x128xf32>
    tpu.vector_store %arg8[%c0_11, %c0_12], %15 {strides = array<i32>} : memref<8x128xf32, #tpu.memory_space<vmem>>, vector<8x128xf32>,
    %17 = tpu.iota {dimensions = array<i32: 1>} : vector<1x128xi32>
    %c4_i32 = arith.constant 4 : i32
    %c0_i32_13 = arith.constant 0 : i32
    %18 = arith.cmpi eq, %c4_i32, %c0_i32_13 : i32
    %c1_i32 = arith.constant 1 : i32
    %19 = arith.select %18, %c1_i32, %c4_i32 : i32
    %20 = vector.broadcast %19 : i32 to vector<1x128xi32>
    %21 = arith.remsi %17, %20 : vector<1x128xi32>
    %c0_i32_14 = arith.constant 0 : i32
    %22 = vector.broadcast %c0_i32_14 : i32 to vector<1x128xi32>
    %23 = arith.cmpi ne, %21, %22 : vector<1x128xi32>
    %c0_i32_15 = arith.constant 0 : i32
    %24 = vector.broadcast %c0_i32_15 : i32 to vector<1x128xi32>
    %25 = arith.cmpi slt, %21, %24 : vector<1x128xi32>
    %c0_i32_16 = arith.constant 0 : i32
    %26 = arith.cmpi slt, %19, %c0_i32_16 : i32
    %27 = vector.broadcast %26 : i1 to vector<1x128xi1>
    %28 = vector.broadcast %27 : vector<1x128xi1> to vector<1x128xi1>
    %29 = arith.xori %25, %28 : vector<1x128xi1>
    %30 = arith.andi %29, %23 : vector<1x128xi1>
    %31 = vector.broadcast %19 : i32 to vector<1x128xi32>
    %32 = arith.addi %21, %31 : vector<1x128xi32>
    %33 = arith.select %30, %32, %21 : vector<1x128xi1>, vector<1x128xi32>
    %cst_17 = arith.constant 0.000000e+00 : f32
    %34 = vector.broadcast %cst_17 : f32 to vector<8x128xf32>
    %35 = arith.select %11, %34, %6 : vector<8x128xi1>, vector<8x128xf32>
    %c127_i32 = arith.constant 127 : i32
    %36 = tpu.dynamic_rotate %35 by %c127_i32 dim 1 : vector<8x128xf32>, i32 -> vector<8x128xf32>
    %c3_i32 = arith.constant 3 : i32
    %37 = vector.broadcast %c3_i32 : i32 to vector<1x128xi32>
    %38 = arith.cmpi slt, %33, %37 : vector<1x128xi32>
    %39 = arith.maximumf %35, %36 : vector<8x128xf32>
    %40 = vector.shape_cast %38 : vector<1x128xi1> to vector<1x128xi1>
    %41 = vector.broadcast %40 : vector<1x128xi1> to vector<8x128xi1>
    %42 = arith.select %41, %39, %35 : vector<8x128xi1>, vector<8x128xf32>
    %c126_i32 = arith.constant 126 : i32
    %43 = tpu.dynamic_rotate %42 by %c126_i32 dim 1 : vector<8x128xf32>, i32 -> vector<8x128xf32>
    %c2_i32 = arith.constant 2 : i32
    %44 = vector.broadcast %c2_i32 : i32 to vector<1x128xi32>
    %45 = arith.cmpi slt, %33, %44 : vector<1x128xi32>
    %46 = arith.maximumf %42, %43 : vector<8x128xf32>
    %47 = vector.shape_cast %45 : vector<1x128xi1> to vector<1x128xi1>
    %48 = vector.broadcast %47 : vector<1x128xi1> to vector<8x128xi1>
    %49 = arith.select %48, %46, %42 : vector<8x128xi1>, vector<8x128xf32>
    %c0_i32_18 = arith.constant 0 : i32
    %50 = vector.broadcast %c0_i32_18 : i32 to vector<1x128xi32>
    %51 = arith.cmpi eq, %33, %50 : vector<1x128xi32>
    %c0_19 = arith.constant 0 : index
    %c0_20 = arith.constant 0 : index
    %52 = vector.load %arg9[%c0_19, %c0_20] : memref<8x128xf32, #tpu.memory_space<vmem>>, vector<8x128xf32>
    %cst_21 = arith.constant 0.000000e+00 : f32
    %53 = vector.shape_cast %51 : vector<1x128xi1> to vector<1x128xi1>
    %54 = vector.broadcast %53 : vector<1x128xi1> to vector<8x128xi1>
    %55 = vector.broadcast %cst_21 : f32 to vector<8x128xf32>
    %56 = arith.select %54, %49, %55 : vector<8x128xi1>, vector<8x128xf32>
    %57 = arith.addf %52, %56 : vector<8x128xf32>
    %c0_22 = arith.constant 0 : index
    %c0_23 = arith.constant 0 : index
    %58 = vector.load %arg9[%c0_22, %c0_23] : memref<8x128xf32, #tpu.memory_space<vmem>>, vector<8x128xf32>
    tpu.vector_store %arg9[%c0_22, %c0_23], %57 {strides = array<i32>} : memref<8x128xf32, #tpu.memory_space<vmem>>, vector<8x128xf32>,
    %c1_i32_24 = arith.constant 1 : i32
    %59 = arith.cmpi eq, %arg1, %c1_i32_24 : i32
    %60 = arith.extui %59 : i1 to i32
    %c0_i32_25 = arith.constant 0 : i32
    %61 = arith.cmpi ne, %60, %c0_i32_25 : i32
    scf.if %61 {
      %c0_26 = arith.constant 0 : index
      %c0_27 = arith.constant 0 : index
      %62 = vector.load %arg8[%c0_26, %c0_27] : memref<8x128xf32, #tpu.memory_space<vmem>>, vector<8x128xf32>
      %cst_28 = arith.constant dense<0x7F800000> : vector<8xf32>
      %63 = vector.multi_reduction <minimumf>, %62, %cst_28 [1] : vector<8x128xf32> to vector<8xf32>
      %64 = vector.shape_cast %63 : vector<8xf32> to vector<8x1xf32>
      %c0_29 = arith.constant 0 : index
      %c0_30 = arith.constant 0 : index
      %65 = vector.load %arg9[%c0_29, %c0_30] : memref<8x128xf32, #tpu.memory_space<vmem>>, vector<8x128xf32>
      %cst_31 = arith.constant dense<0.000000e+00> : vector<8xf32>
      %66 = vector.multi_reduction <add>, %65, %cst_31 [1] : vector<8x128xf32> to vector<8xf32>
      %67 = vector.shape_cast %66 : vector<8xf32> to vector<8x1xf32>
      %68 = arith.addf %64, %67 : vector<8x1xf32>
      %cst_32 = arith.constant 9.99999997E-7 : f32
      %69 = vector.broadcast %cst_32 : f32 to vector<8x1xf32>
      %70 = arith.addf %68, %69 : vector<8x1xf32>
      %71 = arith.divf %64, %70 : vector<8x1xf32>
      %cst_33 = arith.constant 9.99999997E-7 : f32
      %72 = vector.broadcast %cst_33 : f32 to vector<8x1xf32>
      %73 = arith.addf %71, %72 : vector<8x1xf32>
      %74 = math.log %73 : vector<8x1xf32>
      %cst_34 = arith.constant 0.000000e+00 : f32
      %75 = vector.broadcast %cst_34 : f32 to vector<8x1xf32>
      %76 = arith.subf %75, %74 : vector<8x1xf32>
      %c0_35 = arith.constant 0 : index
      %c0_36 = arith.constant 0 : index
      %77 = vector.load %arg6[%c0_35, %c0_36] : memref<8x1xf32, #tpu.memory_space<vmem>>, vector<8x1xf32>
      tpu.vector_store %arg6[%c0_35, %c0_36], %76 {strides = array<i32>} : memref<8x1xf32, #tpu.memory_space<vmem>>, vector<8x1xf32>,
    } else {
    }
    return
  }
  func.func @transform_0(%arg0: i32, %arg1: i32) -> (i32, i32) {
    %c0_i32 = arith.constant 0 : i32
    %c0_i32_0 = arith.constant 0 : i32
    return %arg0, %c0_i32 : i32, i32
  }
  func.func @transform_1(%arg0: i32, %arg1: i32) -> (i32, i32) {
    %c0_i32 = arith.constant 0 : i32
    %c0_i32_0 = arith.constant 0 : i32
    return %arg1, %c0_i32 : i32, i32
  }
  func.func @transform_2(%arg0: i32, %arg1: i32) -> (i32, i32) {
    %c0_i32 = arith.constant 0 : i32
    %c0_i32_0 = arith.constant 0 : i32
    return %arg0, %c0_i32 : i32, i32
  }
  func.func @transform_3(%arg0: i32, %arg1: i32) -> (i32, i32) {
    %c0_i32 = arith.constant 0 : i32
    %c0_i32_0 = arith.constant 0 : i32
    return %c0_i32, %arg1 : i32, i32
  }
  func.func @transform_4(%arg0: i32, %arg1: i32) -> (i32, i32) {
    %c0_i32 = arith.constant 0 : i32
    %c0_i32_0 = arith.constant 0 : i32
    return %arg0, %c0_i32 : i32, i32
  }
}

</mosaic_0001>

<bundles_post_ra>
// kernel: tpu_custom_call.1
= control target key start
LH: loop header
LB: loop body
LE: loop exit
PB: predicated region body
PF: predicated region fallthrough
CT: control target
= control target key end

     0   :  { %s752_s15 = smov 0   ;;  %s754_s16 = smov 0   ;;  %s849_s0 = inlined_call_operand.vmem [shape: bf16[16,64], index: 0, kind: input, shape index: {}]   ;;  %s850_s1 = inlined_call_operand.vmem [shape: bf16[256,64], index: 1, kind: input, shape index: {}]   ;;  %s851_s2 = inlined_call_operand.vmem [shape: s32[16,1], index: 2, kind: input, shape index: {}]   ;;  %s852_s3 = inlined_call_operand.vmem [shape: s32[1,256], index: 3, kind: input, shape index: {}]   ;;  %s853_s4 = inlined_call_operand.vmem [shape: f32[16,1], index: 4, kind: output, shape index: {}]  }
   0x1   :  { %s756_s17 = smov 0   ;;  %s758_s18 = smov 0  }
   0x2   :  { %s760_s19 = smov 0  }
   0x3 LB: > { %s23_s20 = sadd.s32 1, %s710_s17  ;;  %s26_s21 = sadd.s32 1, %s714_s18  ;;  %s718_s19 = sphi %s760_s19, %s14_s19   ;;  %s714_s18 = sphi %s758_s18, %s857_s18   ;;  %s710_s17 = sphi %s756_s17, %s856_s17   ;;  %s706_s16 = sphi %s754_s16, %s855_s16   ;;  %s702_s15 = sphi %s752_s15, %s854_s15  }
   0x4   : > { %p24_p0 = scmp.ge.s32.totalorder %s23_s20, 2  ;;  %p569_p1 = scmp.ge.s32.totalorder %s718_s19, 1 }
   0x5   : > { %p201_p2 = scmp.lt.s32.totalorder %s718_s19, 5 }
   0x6   : > { %s859_s20 = smov (%p24_p0, %s23_s20), 0  ;;  %s861_s21 = smov (!%p24_p0, %s26_s21), %s714_s18 }
   0x7   : > { %p202_p3 = pnand %p569_p1, %p201_p2  ;;  %p28_p4 = scmp.ge.s32.totalorder %s861_s21, 2 }
   0x8   : > { %p237_p5 = scmp.lt.s32.totalorder (!%p202_p3), %s706_s16, 1  ;;  %s571_s22 = sshll.u32 (!%p202_p3), %s702_s15, 4 }
   0x9   : > { %s863_s21 = smov (%p28_p4, %s861_s21), 0  ;;  %205 = sbr.rel (%p202_p3) target bundleno = 733 (0x2dd), region = 36 }
   0xa   : > { %p242_p6 = scmp.lt.s32.totalorder (!%p202_p3), %s571_s22, 31  ;;  %p251_p7 = scmp.lt.s32.totalorder (!%p202_p3), %s702_s15, 1 }
   0xb   : > { %p575_p8 = scmp.ne.s32.totalorder (!%p202_p3), %s702_s15, 0 }
   0xe   : > { %s865_s16 = smov (!%p237_p5, %s706_s16), 1  ;;  %s867_s22 = smov (!%p242_p6, %s571_s22), 31 }
   0xf   : > { %s570_s23 = sshll.u32 %s865_s16, 2  ;;  %s573_s24 = sshll.u32 %s865_s16, 3 }
  0x10   : > { %s240_s27 = scalar_lea.vmem %s849_s0, %s570_s23  ;;  %s572_s28 = sshll.u32 %s867_s22, 2 }
  0x11   : > { %s792_s5 = scalar_lea.vmem %s850_s1, %s572_s28  ;;  %s250_s8 = scalar_lea.vmem %s851_s2, %s573_s24 }
  0x12   : > { %s798_s9 = scalar_select %p251_p7, %s702_s15, 1 }
  0x13   : > { %s803_s12 = scalar_lea.vmem %s853_s4, %s573_s24  ;;  %262 = sbr.rel (%p575_p8) target bundleno = 32 (0x20), region = 40 }
  0x14   : > { %s253_s16 = scalar_lea.vmem %s852_s3, %s798_s9 }
  0x18   : > { %v263_v0 = vld [vmem:[%s240_s27] sm:$0xf]  ;;  %v720_v2 = vmov 3.4028235e+38   ;;  %v721_v3 = vmov 0.0   ;;  %vm267_vm0 = vcmask 519168  }
  0x19   : > { %v264_v1 = vunpack.c.l.bf16 %v263_v0  ;;  %269 = vst [vmem:[#allocation3] sm:$0xff] %v720_v2  ;;  %270 = vst [vmem:[#allocation4] sm:$0xff] %v721_v3 }
  0x1b   : > { %v265_v4 = vmul.f32 10.0, %v264_v1 }
  0x1d   : > { %v266_v5 = vpack.c.bf16 %v265_v4, %v265_v4 }
  0x1f   : > { %268 = vst.msk [vmem:[#allocation2] sm:$0xf] %vm267_vm0, %v266_v5 }
  0x20 PF: > { %v666_v6 = vld [vmem:[%s792_s5 + $0x38] sm:$0xff]   ;;  %v722_v7 = vmov 0.0   ;;  %vm328_vm1 = vcmask 523264   ;;  %v667_v9 = vld [vmem:[%s792_s5 + $0x30] sm:$0xff]   ;;  %v399_v11 = vld [vmem:[%s250_s8] sm:$0xff]  ;;  %vm723_vm2 = vmmov 0   ;;  %v412_v38 = vlaneseq }
  0x21   : > { %598 = vmatprep.subr.bf16.mxu0 %v722_v7  ;;  %v354_v8 = vsel %vm328_vm1, %v666_v6, 0  ;;  %v351_v10 = vsel %vm328_vm1, %v667_v9, 0  ;;  %614 = vmatprep.mubr.msk.bf16.mxu0 %vm723_vm2, %v722_v7  ;;  %v724_v12 = vmov 0   ;;  %v668_v13 = vld [vmem:[%s792_s5 + $0x28] sm:$0xff]   ;;  %v669_v15 = vld [vmem:[%s792_s5 + $0x20] sm:$0xff]   ;;  %v670_v17 = vld [vmem:[%s792_s5 + $0x18] sm:$0xff]  }
  0x22   : > { %599 = vmatpush3.bf16.xpose.msra.mxu0 %v354_v8  ;;  %665 = vset.pattern.permute.xlu0 %v724_v12  ;;  %v348_v14 = vsel %vm328_vm1, %v668_v13, 0  ;;  %v345_v16 = vsel %vm328_vm1, %v669_v15, 0  ;;  %v342_v18 = vsel %vm328_vm1, %v670_v17, 0  ;;  %v671_v19 = vld [vmem:[%s792_s5 + $0x10] sm:$0xff]   ;;  %v672_v21 = vld [vmem:[%s792_s5 + $0x8] sm:$0xff]   ;;  %v673_v23 = vld [vmem:[%s792_s5] sm:$0xff]  }
  0x23   : > { %600 = vmatprep.subr.bf16.mxu0 %v722_v7  ;;  %405 = vperm.xlu0 %665, %v399_v11   ;;  %v339_v20 = vsel %vm328_vm1, %v671_v19, 0  ;;  %v336_v22 = vsel %vm328_vm1, %v672_v21, 0  ;;  %v333_v24 = vsel %vm328_vm1, %v673_v23, 0  ;;  %v585_v32 = vld [vmem:[%s253_s16] ss:$0 sm:$0xff]  ;;  %v408_v33 = vld [vmem:[#allocation3] sm:$0xff] }
  0x24   : > { %s725_s24 = smov 127   ;;  %v413_v39 = vand.u32 127, %v412_v38  ;;  %s726_s25 = smov 126   ;;  %v442_v46 = vld [vmem:[#allocation4] sm:$0xff] }
  0x25   : > { %p586_p9 = scmp.ne.s32.totalorder %s702_s15, 1 }
  0x26   : > { %v271_v25 = vld [vmem:[#allocation2] sm:$0xf]  ;;  %v418_v40 = vand.u32 3, %v413_v39 }
  0x28   : > { %vm429_vm4 = vcmp.lt.s32.totalorder %v418_v40, 3  ;;  %vm436_vm5 = vcmp.lt.s32.totalorder %v418_v40, 2  ;;  %vm441_vm6 = vcmp.eq.s32.totalorder %v418_v40, 0 }
  0x2a   : > { %601 = vmatpush3.bf16.xpose.msra.mxu0 %v351_v10 }
  0x2b   : > { %602 = vmatprep.subr.bf16.mxu0 %v722_v7 }
  0x32   : > { %603 = vmatpush3.bf16.xpose.msra.mxu0 %v348_v14 }
  0x33   : > { %604 = vmatprep.subr.bf16.mxu0 %v722_v7 }
  0x3a   : > { %605 = vmatpush3.bf16.xpose.msra.mxu0 %v345_v16 }
  0x3b   : > { %606 = vmatprep.subr.bf16.mxu0 %v722_v7 }
  0x42   : > { %607 = vmatpush3.bf16.xpose.msra.mxu0 %v342_v18 }
  0x43   : > { %608 = vmatprep.subr.bf16.mxu0 %v722_v7 }
  0x4a   : > { %609 = vmatpush3.bf16.xpose.msra.mxu0 %v339_v20 }
  0x4b   : > { %610 = vmatprep.subr.bf16.mxu0 %v722_v7 }
  0x52   : > { %611 = vmatpush3.bf16.xpose.msra.mxu0 %v336_v22 }
  0x53   : > { %612 = vmatprep.subr.bf16.mxu0 %v722_v7 }
  0x5a   : > { %613 = vmatpush3.bf16.xpose.msra.mxu0 %v333_v24 }
  0x61   : > { %615 = vmatmul.mubr.msk.bf16.vlgmr.msra.gmra.mxu0 %vm328_vm1, %v271_v25 }
  0x9e   : > { %v406_v31 = vpop.permute.xlu0 %405 }
  0x9f   : > { %vm407_vm3 = vcmp.eq.s32.totalorder %v585_v32, %v406_v31 }
 0x121   : > { %v390_v26 = vpop.f32.mrf.mxu0 }
 0x122   : > { %v396_v27 = vmul.f32 1.442695, %v390_v26 }
 0x123   : > { %v616_v28 = vpop.f32.mrf.mxu0 }
 0x124   : > { %674 = vpow2.f32 %v396_v27 }
 0x125   : > { %v393_v29 = vpop.f32.mrf.mxu0 }
 0x127   : > { %v617_v30 = vpop.f32.mrf.mxu0 }
 0x131   : > { %v675_v34 = vpop.eup %674 }
 0x132   : > { %v409_v35 = vsel %vm407_vm3, %v675_v34, 3.4028235e+38  ;;  %v426_v36 = vsel %vm407_vm3, 0.0, %v675_v34 }
 0x133   : > { %v410_v37 = vmin.f32 %v408_v33, %v409_v35  ;;  %427 = vrot.lane.b32.xlu0 %v426_v36, %s725_s24 }
 0x135   : > { %411 = vst [vmem:[#allocation3] sm:$0xff] %v410_v37 }
 0x1a5   : > { %v428_v41 = vpop.permute.xlu0 %427 }
 0x1a6   : > { %v430_v42 = vmax.f32 %v426_v36, %v428_v41 }
 0x1a8   : > { %v433_v43 = vsel %vm429_vm4, %v430_v42, %v426_v36 }
 0x1a9   : > { %434 = vrot.lane.b32.xlu1 %v433_v43, %s726_s25 }
 0x21b   : > { %v435_v44 = vpop.permute.xlu1 %434 }
 0x21c   : > { %v437_v45 = vmax.f32 %v433_v43, %v435_v44 }
 0x21e   : > { %v440_v47 = vsel %vm436_vm5, %v437_v45, %v433_v43  ;;  %451 = sbr.rel (%p586_p9) target bundleno = 733 (0x2dd), region = 44 }
 0x21f   : > { %v445_v48 = vsel %vm441_vm6, %v440_v47, 0.0 }
 0x220   : > { %v446_v49 = vadd.f32 %v445_v48, %v442_v46 }
 0x222   : > { %447 = vst [vmem:[#allocation4] sm:$0xff] %v446_v49 }
 0x223   : > { %v452_v50 = vld [vmem:[#allocation3] sm:$0xff]  ;;  %vm466_vm7 = vcmask 7168  }
 0x224   : > { %453 = vmin.xlane.f32.xlu0 %v452_v50 }
 0x229   : > { %v455_v51 = vld [vmem:[#allocation4] sm:$0xff] }
 0x22a   : > { %456 = vadd.xlane.f32.xlu0 %v455_v51 }
 0x2ad   : > { %v454_v52 = vpop.xlane.xlu0 %453 }
 0x2b3   : > { %v457_v53 = vpop.xlane.xlu0 %456 }
 0x2b4   : > { %v458_v54 = vadd.f32 %v457_v53, %v454_v52 }
 0x2b6   : > { %v459_v55 = vadd.f32 1e-06, %v458_v54 }
 0x2b8   : > { %676 = vrcp.f32 %v459_v55 }
 0x2c5   : > { %v677_v56 = vpop.eup %676 }
 0x2c6   : > { %v461_v57 = vmul.f32 %v677_v56, %v454_v52 }
 0x2c8   : > { %v462_v58 = vadd.f32 1e-06, %v461_v57 }
 0x2ca   : > { %678 = vlog2.f32 %v462_v58 }
 0x2d7   : > { %v679_v59 = vpop.eup %678 }
 0x2d8   : > { %v464_v60 = vmul.f32 0.6931472, %v679_v59 }
 0x2da   : > { %v465_v61 = vsub.f32 0.0, %v464_v60 }
 0x2dc   : > { %467 = vst.msk [vmem:[%s803_s12] sm:$0xff] %vm466_vm7, %v465_v61 }
 0x2dd PF: > { %s14_s19 = sadd.s32 1, %s718_s19   ;;  %s854_s15 = smov %s710_s17 }
 0x2de   : > { %p11_p10 = scmp.ge.s32.totalorder %s14_s19, 6   ;;  %s855_s16 = smov %s714_s18 }
 0x2df   : > { %s856_s17 = smov %s859_s20  ;;  %s857_s18 = smov %s863_s21 }
 0x2e0   :  { %13 = sbr.rel (!%p11_p10) target bundleno = 3 (0x3), region = 83 }

</bundles_post_ra>
